<compile_context>
chip_gen: v6e
topology: v6e:2x2x1
jax: 0.10.0
libtpu: 0.0.40
codegen_flags: <defaults>
</compile_context>

<pallas_src>
from functools import partial

import jax
import jax.numpy as jnp
from jax.experimental import pallas as pl
from jax.experimental.pallas import tpu as pltpu  # noqa: F401  (TPU backend)


def _add_kernel(a_ref, b_ref, o_ref):
    o_ref[...] = a_ref[...] + b_ref[...]


def _lane_dense_2d(shape):
    """Pick a lane-dense (rows, lanes) 2D view of a flat buffer."""
    total = 1
    for d in shape:
        total *= d
    if total % 128 == 0:
        # Fully dense lane dimension (128); only a small sublane tail mask.
        return (total // 128, 128)
    if total % 8 == 0:
        # Keep all 8 sublanes busy; lanes get a masked tail.
        return (8, total // 8)
    return (1, total)


@partial(jax.jit, donate_argnums=(0,))
def pallas_add(x678, x664):
    assert x678.shape == x664.shape and x678.dtype == x664.dtype
    orig_shape = x678.shape

    # Flat, lane-dense 2D view of the buffer (for [1,384,7,7] -> (147, 128)).
    shape2d = _lane_dense_2d(orig_shape)

    a2 = x678.reshape(shape2d)
    b2 = x664.reshape(shape2d)

    out2 = pl.pallas_call(
        _add_kernel,
        out_shape=jax.ShapeDtypeStruct(shape2d, x678.dtype),
        # Single full-array block, no grid: one VMEM-resident invocation.
        in_specs=[
            pl.BlockSpec(shape2d, lambda: (0, 0)),
            pl.BlockSpec(shape2d, lambda: (0, 0)),
        ],
        out_specs=pl.BlockSpec(shape2d, lambda: (0, 0)),
        # Reuse the first operand's buffer; combined with donate_argnums the
        # caller's x678 HBM allocation can be recycled for the output.
        input_output_aliases={0: 0},
    )(a2, b2)

    return out2.reshape(orig_shape)


if __name__ == "__main__":
    key = jax.random.PRNGKey(0)
    k1, k2 = jax.random.split(key)
    # Shapes from the module's forward: NCHW [1, 384, 7, 7]
    x678 = jax.random.normal(k1, (1, 384, 7, 7), dtype=jnp.float32)
    x664 = jax.random.normal(k2, (1, 384, 7, 7), dtype=jnp.float32)

    # Reference computed BEFORE the call (x678 is donated to the kernel).
    ref = x678 + x664

    out = pallas_add(x678, x664)
    out = jax.block_until_ready(out)

    assert out.shape == ref.shape
    assert jnp.allclose(out, ref, atol=1e-6, rtol=1e-6), "mismatch vs reference"
    print("KERNEL_OK")
</pallas_src>

<mosaic_0001>
module attributes {stable_mosaic.version = 11 : i64} {
  func.func @_add_kernel(%arg0: memref<147x128xf32, #tpu.memory_space<vmem>>, %arg1: memref<147x128xf32, #tpu.memory_space<vmem>>, %arg2: memref<147x128xf32, #tpu.memory_space<vmem>>) attributes {dimension_semantics = [], scalar_prefetch = 0 : i64, scratch_operands = 0 : i64, tpu.core_type = #tpu.core_type<tc>} {
    %c0 = arith.constant 0 : index
    %c0_0 = arith.constant 0 : index
    %0 = vector.load %arg0[%c0, %c0_0] : memref<147x128xf32, #tpu.memory_space<vmem>>, vector<147x128xf32>
    %c0_1 = arith.constant 0 : index
    %c0_2 = arith.constant 0 : index
    %1 = vector.load %arg1[%c0_1, %c0_2] : memref<147x128xf32, #tpu.memory_space<vmem>>, vector<147x128xf32>
    %2 = arith.addf %0, %1 : vector<147x128xf32>
    %c0_3 = arith.constant 0 : index
    %c0_4 = arith.constant 0 : index
    %3 = vector.load %arg2[%c0_3, %c0_4] : memref<147x128xf32, #tpu.memory_space<vmem>>, vector<147x128xf32>
    tpu.vector_store %arg2[%c0_3, %c0_4], %2 {strides = array<i32>} : memref<147x128xf32, #tpu.memory_space<vmem>>, vector<147x128xf32>,
    return
  }
}

</mosaic_0001>

<bundles_post_ra>
// kernel: pallas_add.1
= control target key start
LH: loop header
LB: loop body
LE: loop exit
PB: predicated region body
PF: predicated region fallthrough
CT: control target
= control target key end

     0   :  { %s277_s0 = inlined_call_operand.vmem [shape: f32[147,128], index: 0, kind: input, shape index: {}, may-alias: {0,2}]   ;;  %s278_s1 = inlined_call_operand.vmem [shape: f32[147,128], index: 1, kind: input, shape index: {}]   ;;  %s279_s2 = inlined_call_operand.vmem [shape: f32[147,128], index: 2, kind: output, shape index: {}, may-alias: {0,2}]  }
   0x1   :  { %v11_v0 = vld [vmem:[%s277_s0] sm:$0xff]  ;;  %v12_v2 = vld [vmem:[%s277_s0 + $0x8] sm:$0xff]  ;;  %v13_v5 = vld [vmem:[%s277_s0 + $0x10] sm:$0xff] }
   0x2   :  { %v30_v1 = vld [vmem:[%s278_s1] sm:$0xff]  ;;  %v31_v4 = vld [vmem:[%s278_s1 + $0x8] sm:$0xff]  ;;  %v32_v6 = vld [vmem:[%s278_s1 + $0x10] sm:$0xff] }
   0x3   :  { %v49_v3 = vadd.f32 %v30_v1, %v11_v0  ;;  %v50_v7 = vadd.f32 %v31_v4, %v12_v2  ;;  %v51_v8 = vadd.f32 %v32_v6, %v13_v5  ;;  %v14_v9 = vld [vmem:[%s277_s0 + $0x18] sm:$0xff]  ;;  %v15_v11 = vld [vmem:[%s277_s0 + $0x20] sm:$0xff]  ;;  %v35_v15 = vld [vmem:[%s278_s1 + $0x28] sm:$0xff] }
   0x4   :  { %v33_v10 = vld [vmem:[%s278_s1 + $0x18] sm:$0xff]  ;;  %v34_v13 = vld [vmem:[%s278_s1 + $0x20] sm:$0xff]  ;;  %v36_v19 = vld [vmem:[%s278_s1 + $0x30] sm:$0xff] }
   0x5   :  { %68 = vst [vmem:[%s279_s2] sm:$0xff] %v49_v3  ;;  %v52_v12 = vadd.f32 %v33_v10, %v14_v9  ;;  %v53_v16 = vadd.f32 %v34_v13, %v15_v11  ;;  %v37_v22 = vld [vmem:[%s278_s1 + $0x38] sm:$0xff]  ;;  %v38_v24 = vld [vmem:[%s278_s1 + $0x40] sm:$0xff]  ;;  %v39_v28 = vld [vmem:[%s278_s1 + $0x48] sm:$0xff] }
   0x6   :  { %v40_v31 = vld [vmem:[%s278_s1 + $0x50] sm:$0xff]  ;;  %v41_v33 = vld [vmem:[%s278_s1 + $0x58] sm:$0xff]  ;;  %v42_v37 = vld [vmem:[%s278_s1 + $0x60] sm:$0xff] }
   0x7   :  { %v43_v40 = vld [vmem:[%s278_s1 + $0x68] sm:$0xff]  ;;  %v44_v42 = vld [vmem:[%s278_s1 + $0x70] sm:$0xff]  ;;  %v45_v46 = vld [vmem:[%s278_s1 + $0x78] sm:$0xff] }
   0x8   :  { %v46_v49 = vld [vmem:[%s278_s1 + $0x80] sm:$0xff]  ;;  %v47_v51 = vld [vmem:[%s278_s1 + $0x88] sm:$0xff]  ;;  %v48_v55 = vld [vmem:[%s278_s1 + $0x90] sm:$0x7] }
   0xc   :  { %v16_v14 = vld [vmem:[%s277_s0 + $0x28] sm:$0xff] }
   0xd   :  { %69 = vst [vmem:[%s279_s2 + $0x8] sm:$0xff] %v50_v7  ;;  %70 = vst [vmem:[%s279_s2 + $0x10] sm:$0xff] %v51_v8  ;;  %v54_v17 = vadd.f32 %v35_v15, %v16_v14 }
  0x14   :  { %v17_v18 = vld [vmem:[%s277_s0 + $0x30] sm:$0xff]  ;;  %v18_v20 = vld [vmem:[%s277_s0 + $0x38] sm:$0xff] }
  0x15   :  { %71 = vst [vmem:[%s279_s2 + $0x18] sm:$0xff] %v52_v12  ;;  %v55_v21 = vadd.f32 %v36_v19, %v17_v18  ;;  %v56_v25 = vadd.f32 %v37_v22, %v18_v20 }
  0x1c   :  { %v19_v23 = vld [vmem:[%s277_s0 + $0x40] sm:$0xff] }
  0x1d   :  { %72 = vst [vmem:[%s279_s2 + $0x20] sm:$0xff] %v53_v16  ;;  %73 = vst [vmem:[%s279_s2 + $0x28] sm:$0xff] %v54_v17  ;;  %v57_v26 = vadd.f32 %v38_v24, %v19_v23 }
  0x24   :  { %v20_v27 = vld [vmem:[%s277_s0 + $0x48] sm:$0xff]  ;;  %v21_v29 = vld [vmem:[%s277_s0 + $0x50] sm:$0xff] }
  0x25   :  { %74 = vst [vmem:[%s279_s2 + $0x30] sm:$0xff] %v55_v21  ;;  %v58_v30 = vadd.f32 %v39_v28, %v20_v27  ;;  %v59_v34 = vadd.f32 %v40_v31, %v21_v29 }
  0x2c   :  { %v22_v32 = vld [vmem:[%s277_s0 + $0x58] sm:$0xff] }
  0x2d   :  { %75 = vst [vmem:[%s279_s2 + $0x38] sm:$0xff] %v56_v25  ;;  %76 = vst [vmem:[%s279_s2 + $0x40] sm:$0xff] %v57_v26  ;;  %v60_v35 = vadd.f32 %v41_v33, %v22_v32 }
  0x34   :  { %v23_v36 = vld [vmem:[%s277_s0 + $0x60] sm:$0xff]  ;;  %v24_v38 = vld [vmem:[%s277_s0 + $0x68] sm:$0xff] }
  0x35   :  { %77 = vst [vmem:[%s279_s2 + $0x48] sm:$0xff] %v58_v30  ;;  %v61_v39 = vadd.f32 %v42_v37, %v23_v36  ;;  %v62_v43 = vadd.f32 %v43_v40, %v24_v38 }
  0x3c   :  { %v25_v41 = vld [vmem:[%s277_s0 + $0x70] sm:$0xff] }
  0x3d   :  { %78 = vst [vmem:[%s279_s2 + $0x50] sm:$0xff] %v59_v34  ;;  %79 = vst [vmem:[%s279_s2 + $0x58] sm:$0xff] %v60_v35  ;;  %v63_v44 = vadd.f32 %v44_v42, %v25_v41 }
  0x44   :  { %v26_v45 = vld [vmem:[%s277_s0 + $0x78] sm:$0xff]  ;;  %v27_v47 = vld [vmem:[%s277_s0 + $0x80] sm:$0xff] }
  0x45   :  { %80 = vst [vmem:[%s279_s2 + $0x60] sm:$0xff] %v61_v39  ;;  %v64_v48 = vadd.f32 %v45_v46, %v26_v45  ;;  %v65_v52 = vadd.f32 %v46_v49, %v27_v47 }
  0x4c   :  { %v28_v50 = vld [vmem:[%s277_s0 + $0x88] sm:$0xff] }
  0x4d   :  { %81 = vst [vmem:[%s279_s2 + $0x68] sm:$0xff] %v62_v43  ;;  %82 = vst [vmem:[%s279_s2 + $0x70] sm:$0xff] %v63_v44  ;;  %v66_v53 = vadd.f32 %v47_v51, %v28_v50 }
  0x54   :  { %v29_v54 = vld [vmem:[%s277_s0 + $0x90] sm:$0x7] }
  0x55   :  { %83 = vst [vmem:[%s279_s2 + $0x78] sm:$0xff] %v64_v48  ;;  %v67_v56 = vadd.f32 %v48_v55, %v29_v54  ;;  %84 = vst [vmem:[%s279_s2 + $0x80] sm:$0xff] %v65_v52 }
  0x56   :  { %85 = vst [vmem:[%s279_s2 + $0x88] sm:$0xff] %v66_v53 }
  0x57   :  { %86 = vst [vmem:[%s279_s2 + $0x90] sm:$0x7] %v67_v56 }

</bundles_post_ra>
